<compile_context>
chip_gen: v7x
topology: tpu7x:2x2x1
jax: 0.10.0
libtpu: 0.0.40
codegen_flags: <defaults>
</compile_context>

<pallas_src>
import functools

import jax
import jax.numpy as jnp
from jax.experimental import pallas as pl
from jax.experimental.pallas import tpu as pltpu


# ----------------------------- math helpers (f32) ---------------------------


def _layernorm(x, g, b, eps):
    mu = jnp.mean(x, axis=-1, keepdims=True)
    var = jnp.mean((x - mu) ** 2, axis=-1, keepdims=True)
    return (x - mu) * jax.lax.rsqrt(var + eps) * g + b


def _gelu_tanh(x):
    # gelu_pytorch_tanh: 0.5*x*(1+tanh(sqrt(2/pi)*(x+0.044715*x^3)))
    c = 0.7978845608028654  # sqrt(2/pi)
    return 0.5 * x * (1.0 + jnp.tanh(c * (x + 0.044715 * x * x * x)))


# ----------------------------- Pallas kernels -------------------------------


def patch_embed_kernel(p_ref, w_ref, bp_ref, o_ref):
    # p_ref: (1, P, K) bf16   w_ref: (K, D) bf16   bp_ref: (P, D) f32 (conv bias + pos)
    out = jnp.dot(p_ref[0], w_ref[...], preferred_element_type=jnp.float32)
    o_ref[0] = (out + bp_ref[...]).astype(o_ref.dtype)


def encoder_kernel(x_ref, vec_ref, wq_ref, wk_ref, wv_ref, wo_ref, w1_ref, w2_ref,
                   o_ref,
                   carry, k_sc, v_sc,
                   *, num_heads, head_dim, eps, scale, valid_len, q_tile):
    f32 = jnp.float32
    bf16 = jnp.bfloat16

    l = pl.program_id(1)
    qi = pl.program_id(2)
    last_layer = pl.num_programs(1) - 1

    S_pad, D = carry.shape
    I = w1_ref.shape[2]
    H, hd, tq = num_heads, head_dim, q_tile

    # Packed per-layer vectors: 0 ln1_g 1 ln1_b 2 bq 3 bk 4 bv 5 bo 6 ln2_g 7 ln2_b
    #                           8 b1(I) 9 b2   10 post_g 11 post_b
    vec = vec_ref[0]                                          # [12, max(D, I)] f32
    ln1_g, ln1_b = vec[0:1, :D], vec[1:2, :D]
    bq, bk, bv, bo = vec[2:3, :D], vec[3:4, :D], vec[4:5, :D], vec[5:6, :D]
    ln2_g, ln2_b = vec[6:7, :D], vec[7:8, :D]
    b1, b2 = vec[8:9, :I], vec[9:10, :D]
    post_g, post_b = vec[10:11, :D], vec[11:12, :D]

    # ---- init running hidden state from the embeddings (new batch element) ----
    @pl.when((l == 0) & (qi == 0))
    def _():
        carry[...] = x_ref[0].astype(f32)

    # ---- LN1 + K/V projection of the FULL sequence, once per (batch, layer) ----
    @pl.when(qi == 0)
    def _():
        h = _layernorm(carry[...], ln1_g, ln1_b, eps).astype(bf16)
        k_sc[...] = (jnp.dot(h, wk_ref[0], preferred_element_type=f32) + bk).astype(bf16)
        v_sc[...] = (jnp.dot(h, wv_ref[0], preferred_element_type=f32) + bv).astype(bf16)

    # ---- this query tile: LN1 + Q (scale folded in), attention over full seq ----
    row0 = pl.multiple_of(qi * tq, tq)
    x_q = carry[pl.ds(row0, tq), :]                            # [tq, D] f32 (residual)
    h_q = _layernorm(x_q, ln1_g, ln1_b, eps).astype(bf16)
    q = (jnp.dot(h_q, wq_ref[0], preferred_element_type=f32) + bq) * scale

    # heads as a dot_general batch dim (no concat, no explicit K transpose).
    qh = q.reshape(tq, H, hd).transpose(1, 0, 2).astype(bf16)      # [H, tq, hd]
    kh = k_sc[...].reshape(S_pad, H, hd).transpose(1, 0, 2)        # [H, S,  hd]
    vh = v_sc[...].reshape(S_pad, H, hd).transpose(1, 0, 2)        # [H, S,  hd]

    logits = jnp.einsum('hqd,hkd->hqk', qh, kh, preferred_element_type=f32)
    if S_pad > valid_len:  # static: mask padded key columns
        col = jax.lax.broadcasted_iota(jnp.int32, logits.shape, 2)
        logits = jnp.where(col < valid_len, logits, -1e30)
    m = jnp.max(logits, axis=-1, keepdims=True)
    p = jnp.exp(logits - m)                                        # f32 softmax
    probs = p * (1.0 / jnp.sum(p, axis=-1, keepdims=True))         # exact tiny reciprocal

    ctx = jnp.einsum('hqk,hkd->hqd', probs.astype(bf16), vh,
                     preferred_element_type=f32)                   # [H, tq, hd]
    ctx = ctx.transpose(1, 0, 2).reshape(tq, H * hd)               # [tq, D]
    attn = jnp.dot(ctx.astype(bf16), wo_ref[0], preferred_element_type=f32) + bo
    x1 = x_q + attn                                                # residual, f32

    # ---- LN2 + MLP ----
    h2 = _layernorm(x1, ln2_g, ln2_b, eps)
    mlp = jnp.dot(h2.astype(bf16), w1_ref[0], preferred_element_type=f32) + b1
    mlp = _gelu_tanh(mlp)
    mlp = jnp.dot(mlp.astype(bf16), w2_ref[0], preferred_element_type=f32) + b2
    x2 = x1 + mlp

    # Chain: these rows feed layer l+1 (this layer's K/V were already materialized
    # from the pre-update carry, and each qi tile only touches its own rows).
    carry[pl.ds(row0, tq), :] = x2

    # Fused post-LayerNorm on the last layer; output block (batch-only index map)
    # stays resident in VMEM and is written back to HBM once per batch element.
    @pl.when(l == last_layer)
    def _():
        o_ref[0, pl.ds(row0, tq), :] = _layernorm(x2, post_g, post_b, eps).astype(o_ref.dtype)


# ----------------------------- wrappers --------------------------------------


def _round_up(x, m):
    return ((x + m - 1) // m) * m


def _default_q_tile(seq_len):
    # Multiples of 16 only (bf16 sublane packing); 128 for long sequences.
    return 128 if seq_len >= 256 else _round_up(seq_len, 16)


def _default_vmem_limit():
    try:
        cap = pltpu.get_tpu_info().vmem_capacity_bytes
    except Exception:
        cap = 128 * 1024 * 1024
    # ~100 MiB on 128 MiB parts (v5e/v6e), ~56 MiB on 64 MiB parts (v7x).
    return int(min(cap - 8 * 1024 * 1024, 100 * 1024 * 1024))


def patch_embed_call(patches, conv_w, bias_pos):
    B, P, K = patches.shape
    D = conv_w.shape[1]
    return pl.pallas_call(
        patch_embed_kernel,
        out_shape=jax.ShapeDtypeStruct((B, P, D), jnp.float32),
        grid=(B,),
        in_specs=[
            pl.BlockSpec((1, P, K), lambda b: (b, 0, 0)),
            pl.BlockSpec((K, D), lambda b: (0, 0)),
            pl.BlockSpec((P, D), lambda b: (0, 0)),
        ],
        out_specs=pl.BlockSpec((1, P, D), lambda b: (b, 0, 0)),
        compiler_params=pltpu.CompilerParams(dimension_semantics=("parallel",)),
    )(patches, conv_w, bias_pos)


def encoder_call(x, stacked, *, num_heads, head_dim, eps, scale, valid_len, q_tile):
    B, S_pad, D = x.shape
    L = stacked["wq"].shape[0]
    I = stacked["w1"].shape[2]
    V = stacked["vec"].shape[2]
    tq = q_tile
    assert S_pad % tq == 0 and tq % 8 == 0
    nq = S_pad // tq

    kernel = functools.partial(
        encoder_kernel, num_heads=num_heads, head_dim=head_dim, eps=eps,
        scale=scale, valid_len=valid_len, q_tile=tq)

    def per_layer(shape):
        return pl.BlockSpec((1,) + shape, lambda b, l, qi: (l, 0, 0))

    return pl.pallas_call(
        kernel,
        out_shape=jax.ShapeDtypeStruct((B, S_pad, D), jnp.float32),
        # Layer axis OUTSIDE the query-tile axis: weights fetched once per (b, l),
        # layer l+1's weight DMA pipelines under layer l's nq compute steps.
        grid=(B, L, nq),
        in_specs=[
            pl.BlockSpec((1, S_pad, D), lambda b, l, qi: (b, 0, 0)),  # embeddings
            per_layer((12, V)),                                        # packed vectors
            per_layer((D, D)), per_layer((D, D)),                      # wq, wk
            per_layer((D, D)), per_layer((D, D)),                      # wv, wo
            per_layer((D, I)), per_layer((I, D)),                      # fc1, fc2
        ],
        out_specs=pl.BlockSpec((1, S_pad, D), lambda b, l, qi: (b, 0, 0)),
        scratch_shapes=[
            pltpu.VMEM((S_pad, D), jnp.float32),    # running hidden state (carry)
            pltpu.VMEM((S_pad, D), jnp.bfloat16),   # K of the full sequence (this layer)
            pltpu.VMEM((S_pad, D), jnp.bfloat16),   # V of the full sequence (this layer)
        ],
        compiler_params=pltpu.CompilerParams(
            dimension_semantics=("parallel", "arbitrary", "arbitrary"),
            vmem_limit_bytes=_default_vmem_limit(),
        ),
    )(x, stacked["vec"], stacked["wq"], stacked["wk"], stacked["wv"],
      stacked["wo"], stacked["w1"], stacked["w2"])


# ----------------------------- model ------------------------------------------


class Config:
    def __init__(self):
        # small synthetic config (production Siglip: 1152/4304/27/16/3/384/14)
        self.hidden_size = 32
        self.intermediate_size = 64
        self.num_hidden_layers = 2
        self.num_attention_heads = 4
        self.num_channels = 3
        self.image_size = 32
        self.patch_size = 8
        self.layer_norm_eps = 1e-6
        self.attention_dropout = 0.0  # dropout with p=0 / eval is identity


def init_params(cfg, key):
    D, I = cfg.hidden_size, cfg.intermediate_size
    C, ps = cfg.num_channels, cfg.patch_size
    L = cfg.num_hidden_layers
    P = (cfg.image_size // ps) ** 2
    V = max(D, I)
    std = 0.02
    ks = iter(jax.random.split(key, 3 + 12 * L))

    def lin(out_dim, in_dim):
        # PyTorch Linear stores W as [out, in]; keep [in, out] so x @ W (bf16 for MXU).
        w = (jax.random.normal(next(ks), (out_dim, in_dim), jnp.float32) * std).T
        b = jax.random.normal(next(ks), (out_dim,), jnp.float32) * std
        return w.astype(jnp.bfloat16), b

    conv_w = jax.random.normal(next(ks), (D, C, ps, ps), jnp.float32) * std
    conv_b = jax.random.normal(next(ks), (D,), jnp.float32) * std
    pos_emb = jax.random.normal(next(ks), (P, D), jnp.float32) * std

    params = {
        # Conv2d weight [D, C, ps, ps] flattened to [K=C*ps*ps, D], bf16.
        "conv_w": conv_w.reshape(D, C * ps * ps).T.astype(jnp.bfloat16),
        # conv bias + position embedding fused once outside the kernel.
        "bias_pos": conv_b[None, :] + pos_emb,            # [P, D] f32
    }

    post_g = jnp.ones((D,), jnp.float32)
    post_b = jnp.zeros((D,), jnp.float32)
    ln_g = jnp.ones((D,), jnp.float32)
    ln_b = jnp.zeros((D,), jnp.float32)

    def pad_row(v):
        return jnp.pad(v, (0, V - v.shape[0]))

    mats = {n: [] for n in ("wq", "wk", "wv", "wo", "w1", "w2")}
    vecs = []
    for _ in range(L):
        wq, bq = lin(D, D)
        wk, bk = lin(D, D)
        wv, bv = lin(D, D)
        wo, bo = lin(D, D)
        w1, b1 = lin(I, D)
        w2, b2 = lin(D, I)
        mats["wq"].append(wq); mats["wk"].append(wk)
        mats["wv"].append(wv); mats["wo"].append(wo)
        mats["w1"].append(w1); mats["w2"].append(w2)
        vecs.append(jnp.stack([pad_row(r) for r in
                               (ln_g, ln_b, bq, bk, bv, bo, ln_g, ln_b,
                                b1, b2, post_g, post_b)]))

    params["layers"] = {k: jnp.stack(v, axis=0) for k, v in mats.items()}
    params["layers"]["vec"] = jnp.stack(vecs, axis=0)     # [L, 12, max(D, I)]
    return params


def siglip_vision_transformer(pixel_values, params, cfg, *, q_tile=None):
    B, C, H, W = pixel_values.shape
    ps = cfg.patch_size
    gh, gw = H // ps, W // ps
    P = gh * gw
    D = cfg.hidden_size
    head_dim = D // cfg.num_attention_heads
    scale = head_dim ** (-0.5)

    # --- SiglipVisionEmbeddings: stride==kernel "valid" conv == patch extract + matmul
    patches = pixel_values.reshape(B, C, gh, ps, gw, ps)
    patches = patches.transpose(0, 2, 4, 1, 3, 5).reshape(B, P, C * ps * ps)
    embeddings = patch_embed_call(patches.astype(jnp.bfloat16),
                                  params["conv_w"], params["bias_pos"])   # [B,P,D] f32

    # --- pad the sequence to a multiple of the query tile (keys masked in-kernel) ---
    tq = q_tile if q_tile is not None else _default_q_tile(P)
    S_pad = _round_up(P, tq)
    if S_pad != P:
        embeddings = jnp.pad(embeddings, ((0, 0), (0, S_pad - P), (0, 0)))

    # --- SiglipEncoder (layers chained via VMEM carry) + fused post-LayerNorm ---
    out = encoder_call(embeddings, params["layers"],
                       num_heads=cfg.num_attention_heads, head_dim=head_dim,
                       eps=cfg.layer_norm_eps, scale=scale,
                       valid_len=P, q_tile=tq)
    return out[:, :P, :]


# ----------------------------- pure-JAX reference ------------------------------


def reference_forward(pixel_values, params, cfg):
    """Chained-layer reference mirroring the kernel numerics (bf16 MXU operands)."""
    f32, bf16 = jnp.float32, jnp.bfloat16
    B, C, Himg, Wimg = pixel_values.shape
    ps = cfg.patch_size
    gh, gw = Himg // ps, Wimg // ps
    P = gh * gw
    D, I = cfg.hidden_size, cfg.intermediate_size
    Hn = cfg.num_attention_heads
    hd = D // Hn
    scale = hd ** (-0.5)
    eps = cfg.layer_norm_eps

    patches = pixel_values.reshape(B, C, gh, ps, gw, ps)
    patches = patches.transpose(0, 2, 4, 1, 3, 5).reshape(B, P, C * ps * ps)
    x = jnp.dot(patches.astype(bf16), params["conv_w"],
                preferred_element_type=f32) + params["bias_pos"]

    lyr = params["layers"]
    vec = lyr["vec"]
    for l in range(cfg.num_hidden_layers):
        ln1_g, ln1_b = vec[l, 0, :D], vec[l, 1, :D]
        bq, bk, bv, bo = vec[l, 2, :D], vec[l, 3, :D], vec[l, 4, :D], vec[l, 5, :D]
        ln2_g, ln2_b = vec[l, 6, :D], vec[l, 7, :D]
        b1, b2 = vec[l, 8, :I], vec[l, 9, :D]

        h = _layernorm(x, ln1_g, ln1_b, eps).astype(bf16)
        q = (jnp.dot(h, lyr["wq"][l], preferred_element_type=f32) + bq) * scale
        k = (jnp.dot(h, lyr["wk"][l], preferred_element_type=f32) + bk).astype(bf16)
        v = (jnp.dot(h, lyr["wv"][l], preferred_element_type=f32) + bv).astype(bf16)

        qh = q.reshape(B, P, Hn, hd).transpose(0, 2, 1, 3).astype(bf16)
        kh = k.reshape(B, P, Hn, hd).transpose(0, 2, 1, 3)
        vh = v.reshape(B, P, Hn, hd).transpose(0, 2, 1, 3)
        logits = jnp.einsum('bhqd,bhkd->bhqk', qh, kh, preferred_element_type=f32)
        m = jnp.max(logits, axis=-1, keepdims=True)
        p = jnp.exp(logits - m)
        probs = p * (1.0 / jnp.sum(p, axis=-1, keepdims=True))
        ctx = jnp.einsum('bhqk,bhkd->bhqd', probs.astype(bf16), vh,
                         preferred_element_type=f32)
        ctx = ctx.transpose(0, 2, 1, 3).reshape(B, P, D)
        attn = jnp.dot(ctx.astype(bf16), lyr["wo"][l], preferred_element_type=f32) + bo
        x1 = x + attn

        h2 = _layernorm(x1, ln2_g, ln2_b, eps)
        mlp = jnp.dot(h2.astype(bf16), lyr["w1"][l], preferred_element_type=f32) + b1
        mlp = _gelu_tanh(mlp)
        mlp = jnp.dot(mlp.astype(bf16), lyr["w2"][l], preferred_element_type=f32) + b2
        x = x1 + mlp

    return _layernorm(x, vec[0, 10, :D], vec[0, 11, :D], eps)


# ----------------------------- main --------------------------------------------


if __name__ == "__main__":
    cfg = Config()
    key = jax.random.PRNGKey(0)
    k_params, k_input = jax.random.split(key)
    params = init_params(cfg, k_params)

    B = 2
    pixel_values = jax.random.normal(
        k_input, (B, cfg.num_channels, cfg.image_size, cfg.image_size), jnp.float32)

    P = (cfg.image_size // cfg.patch_size) ** 2   # 16 patches

    # Run 1: q_tile=8 -> 2 query tiles per layer (exercises the chained carry path).
    out = jax.block_until_ready(
        siglip_vision_transformer(pixel_values, params, cfg, q_tile=8))
    # Run 2: q_tile=24 -> sequence padded 16 -> 24 (exercises key masking / pad slice).
    out_pad = jax.block_until_ready(
        siglip_vision_transformer(pixel_values, params, cfg, q_tile=24))

    ref = jax.block_until_ready(reference_forward(pixel_values, params, cfg))

    assert out.shape == (B, P, cfg.hidden_size)
    assert out.dtype == jnp.float32
    assert out_pad.shape == (B, P, cfg.hidden_size)
    assert jnp.isfinite(out).all()
    assert jnp.allclose(out, ref, atol=2e-3, rtol=2e-3), \
        float(jnp.max(jnp.abs(out - ref)))
    assert jnp.allclose(out_pad, ref, atol=2e-3, rtol=2e-3), \
        float(jnp.max(jnp.abs(out_pad - ref)))
    print("KERNEL_OK")
</pallas_src>

<mosaic_0001>
module attributes {stable_mosaic.version = 11 : i64} {
  func.func @patch_embed_kernel(%arg0: i32, %arg1: memref<1x16x192xbf16, #tpu.memory_space<vmem>>, %arg2: memref<192x32xbf16, #tpu.memory_space<vmem>>, %arg3: memref<16x32xf32, #tpu.memory_space<vmem>>, %arg4: memref<1x16x32xf32, #tpu.memory_space<vmem>>) attributes {dimension_semantics = [#tpu.dimension_semantics<parallel>], iteration_bounds = array<i64: 2>, scalar_prefetch = 0 : i64, scratch_operands = 0 : i64, tpu.core_type = #tpu.core_type<tc>, window_params = [{transform_indices = @transform_0, window_bounds = array<i64: 1, 16, 192>}, {pipeline_mode = #tpu.pipeline_mode<synchronous>, transform_indices = @transform_1, window_bounds = array<i64: 192, 32>}, {pipeline_mode = #tpu.pipeline_mode<synchronous>, transform_indices = @transform_2, window_bounds = array<i64: 16, 32>}, {transform_indices = @transform_3, window_bounds = array<i64: 1, 16, 32>}]} {
    %c0 = arith.constant 0 : index
    %c0_0 = arith.constant 0 : index
    %c0_1 = arith.constant 0 : index
    %0 = vector.load %arg1[%c0, %c0_0, %c0_1] : memref<1x16x192xbf16, #tpu.memory_space<vmem>>, vector<1x16x192xbf16>
    %1 = vector.shape_cast %0 : vector<1x16x192xbf16> to vector<16x192xbf16>
    %c0_2 = arith.constant 0 : index
    %c0_3 = arith.constant 0 : index
    %2 = vector.load %arg2[%c0_2, %c0_3] : memref<192x32xbf16, #tpu.memory_space<vmem>>, vector<192x32xbf16>
    %cst = arith.constant dense<0.000000e+00> : vector<16x32xf32>
    %3 = tpu.matmul %1, %2, %cst {dimension_numbers = #tpu.dot_dimension_numbers<[1], [0], [0], [1], [0, 0, 1, 1], [], []>} : vector<16x192xbf16>, vector<192x32xbf16>, vector<16x32xf32> -> vector<16x32xf32>
    %c0_4 = arith.constant 0 : index
    %c0_5 = arith.constant 0 : index
    %4 = vector.load %arg3[%c0_4, %c0_5] : memref<16x32xf32, #tpu.memory_space<vmem>>, vector<16x32xf32>
    %5 = arith.addf %3, %4 : vector<16x32xf32>
    %c0_6 = arith.constant 0 : index
    %c0_7 = arith.constant 0 : index
    %c0_8 = arith.constant 0 : index
    %6 = vector.load %arg4[%c0_6, %c0_7, %c0_8] : memref<1x16x32xf32, #tpu.memory_space<vmem>>, vector<1x16x32xf32>
    %7 = vector.shape_cast %6 : vector<1x16x32xf32> to vector<16x32xf32>
    %8 = vector.shape_cast %5 : vector<16x32xf32> to vector<1x16x32xf32>
    tpu.vector_store %arg4[%c0_6, %c0_7, %c0_8], %8 {strides = array<i32>} : memref<1x16x32xf32, #tpu.memory_space<vmem>>, vector<1x16x32xf32>,
    return
  }
  func.func @transform_0(%arg0: i32) -> (i32, i32, i32) {
    %c0_i32 = arith.constant 0 : i32
    %c0_i32_0 = arith.constant 0 : i32
    %c0_i32_1 = arith.constant 0 : i32
    return %arg0, %c0_i32, %c0_i32_0 : i32, i32, i32
  }
  func.func @transform_1(%arg0: i32) -> (i32, i32) {
    %c0_i32 = arith.constant 0 : i32
    %c0_i32_0 = arith.constant 0 : i32
    %c0_i32_1 = arith.constant 0 : i32
    return %c0_i32, %c0_i32_0 : i32, i32
  }
  func.func @transform_2(%arg0: i32) -> (i32, i32) {
    %c0_i32 = arith.constant 0 : i32
    %c0_i32_0 = arith.constant 0 : i32
    %c0_i32_1 = arith.constant 0 : i32
    return %c0_i32, %c0_i32_0 : i32, i32
  }
  func.func @transform_3(%arg0: i32) -> (i32, i32, i32) {
    %c0_i32 = arith.constant 0 : i32
    %c0_i32_0 = arith.constant 0 : i32
    %c0_i32_1 = arith.constant 0 : i32
    return %arg0, %c0_i32, %c0_i32_0 : i32, i32, i32
  }
}

</mosaic_0001>

<bundles_post_ra>
// kernel: tpu_custom_call.1
= control target key start
LH: loop header
LB: loop body
LE: loop exit
PB: predicated region body
PF: predicated region fallthrough
CT: control target
= control target key end

     0   :  { %8 = vsyncpa [#allocation3], 0  ;;  %s722_s0 = inlined_call_operand.vmem [shape: bf16[2,16,192], index: 0, kind: input, shape index: {}]   ;;  %s723_s1 = inlined_call_operand.vmem [shape: bf16[192,32], index: 1, kind: input, shape index: {}]   ;;  %s724_s2 = inlined_call_operand.vmem [shape: f32[16,32], index: 2, kind: input, shape index: {}]   ;;  %s725_s3 = inlined_call_operand.hbm [shape: f32[2,16,32], index: 3, kind: output, shape index: {}]  }
   0x1   :  { %10 = vsyncpa [#allocation3 + $0x1], 0  ;;  %s577_s12 = smov 0   ;;  %s579_s13 = smov 0  }
   0x2   :  { %s581_s14 = smov 0   ;;  %s583_s15 = smov 0  }
   0x3 LB: > { %s598_s16 = sadd.s32 4294967295, %s551_s15   ;;  %s403_s17 = sadd.s32 4294967294, %s551_s15   ;;  %s551_s15 = sphi %s583_s15, %s731_s15   ;;  %s547_s14 = sphi %s581_s14, %s730_s14   ;;  %s543_s13 = sphi %s579_s13, %s729_s13   ;;  %s539_s12 = sphi %s577_s12, %s728_s12  }
   0x4   : > { %s602_s18 = sadd.s32 1, %s551_s15   ;;  %s91_s19 = sadd.s32 1, %s547_s14 }
   0x5   : > { %s88_s20 = ssub.s32 %s551_s15, %s602_s18  ;;  %p101_p0 = scmp.ne.s32.totalorder %s547_s14, %s543_s13 }
   0x6   : > { %p89_p1 = scmp.eq.s32.totalorder %s88_s20, 0  ;;  %p102_p2 = scmp.eq.s32.totalorder %s598_s16, 1 }
   0x7   : > { %p107_p3 = scmp.ne.s32.totalorder %s543_s13, %s539_s12  ;;  %p108_p4 = scmp.eq.s32.totalorder %s403_s17, 1 }
   0x8   : > { %s613_s21 = scalar_select %p89_p1, %s547_s14, %s91_s19  }
   0x9   : > { %p615_p5 = por %p102_p2, %p101_p0  ;;  %p619_p6 = por %p108_p4, %p107_p3 }
   0xa   : > { %p406_p7 = scmp.ge.s32.totalorder %s551_s15, 1  ;;  %p140_p8 = scmp.lt.s32.totalorder %s551_s15, 3 }
   0xc   : > { %p141_p9 = pnand %p406_p7, %p140_p8 }
   0xd   : > { %v474_v0 = vld [vmem:[%s723_s1] sm:$0xff] (!%p141_p9)   ;;  %v553_v1 = vmov (!%p141_p9), 0   ;;  %p164_p10 = scmp.lt.s32.totalorder (!%p141_p9), %s598_s16, 1  ;;  %v475_v2 = vld [vmem:[%s723_s1 + $0x8] sm:$0xff] (!%p141_p9)   ;;  %v476_v3 = vld [vmem:[%s723_s1 + $0x10] sm:$0xff] (!%p141_p9)   ;;  %vm279_vm0 = vcmask (!%p141_p9), 523264  }
   0xe   : > { %144 = sbr.rel (%p141_p9) target bundleno = 293 (0x125), region = 32  ;;  %283 = vmatprep.subr.bf16.mxu0 (!%p141_p9), %v553_v1  ;;  %v477_v4 = vld [vmem:[%s723_s1 + $0x18] sm:$0xff] (!%p141_p9)   ;;  %v478_v6 = vld [vmem:[%s723_s1 + $0x20] sm:$0xff] (!%p141_p9)   ;;  %v479_v7 = vld [vmem:[%s723_s1 + $0x28] sm:$0xff] (!%p141_p9)   ;;  %s161_s8 = sand.u32 (!%p141_p9), 1, %s543_s13   ;;  %vm324_vm1 = vcmask (!%p141_p9), 261120  }
   0xf   : > { %284 = vmatpush1.bf16.msra.mxu0 (!%p141_p9), %v474_v0  ;;  %v480_v8 = vld [vmem:[%s723_s1 + $0x30] sm:$0xff] (!%p141_p9)   ;;  %v481_v9 = vld [vmem:[%s723_s1 + $0x38] sm:$0xff] (!%p141_p9)   ;;  %v482_v10 = vld [vmem:[%s723_s1 + $0x40] sm:$0xff] (!%p141_p9)   ;;  %s407_s10 = sshll.u32 (!%p141_p9), %s161_s8, 4  ;;  %s431_s24 = sshll.u32 (!%p141_p9), %s598_s16, 8 }
  0x10   : > { %285 = vmatprep.subr.bf16.mxu0 (!%p141_p9), %v553_v1  ;;  %v483_v11 = vld [vmem:[%s723_s1 + $0x48] sm:$0xff] (!%p141_p9)   ;;  %v484_v12 = vld [vmem:[%s723_s1 + $0x50] sm:$0xff] (!%p141_p9)   ;;  %v485_v13 = vld [vmem:[%s723_s1 + $0x58] sm:$0xff] (!%p141_p9)   ;;  %s163_s19 = scalar_lea.vmem (!%p141_p9), [#allocation2], %s407_s10  ;;  %s554_s30 = smov (!%p141_p9), [#allocation2]  }
  0x11   : > { %v196_v15 = vld [vmem:[%s724_s2] sm:$0xff] (!%p141_p9)  ;;  %s341_s20 = sshll.u32 (!%p141_p9), %s163_s19, 4  ;;  %v197_v17 = vld [vmem:[%s724_s2 + $0x8] sm:$0xff] (!%p141_p9)  ;;  %s674_s20 = int_to_ptr.vmem [resolvable:$true] %s341_s20 }
  0x12   : > { %s489_s29 = scalar_lea.vmem (!%p141_p9), %s674_s20, 256 }
  0x13   : > { %286 = vmatpush1.bf16.msra.mxu0 (!%p141_p9), %v475_v2  ;;  %p490_p11 = scmp.ne.s32.totalorder (!%p141_p9), %s674_s20, %s489_s29 }
  0x14   : > { %287 = vmatprep.subr.bf16.mxu0 (!%p141_p9), %v553_v1 }
  0x15   : > { %s165_s28 = scalar_select %p164_p10, %s598_s16, 1 }
  0x16   : > { %s681_s16 = scalar_lea.sflag [#allocation3], %s161_s8  ;;  %p491_p12 = pnand %p490_p11, %p615_p5 }
  0x17   : > { %s430_s4 = sshll.u32 %s165_s28, 4  ;;  %288 = vmatpush1.bf16.msra.mxu0 %v476_v3  ;;  %s679_s28 = scalar_lea.hbm %s725_s3, %s431_s24 }
  0x18   : > { %s168_s9 = scalar_lea.vmem %s722_s0, %s430_s4  ;;  %289 = vmatprep.subr.bf16.mxu0 %v553_v1  ;;  %p492_p13 = pneg %p491_p12 }
  0x19   : > { %v488_v5 = vld [vmem:[%s168_s9 + $0x4] ss:$8 sps:$4 sm:$0xff]   ;;  %v486_v14 = vld [vmem:[%s168_s9] ss:$8 sps:$4 sm:$0xff]   ;;  %s493_s4 = sshll.u32 %s554_s30, 4  ;;  %s494_s4 = int_to_ptr.vmem [resolvable:$false] %s493_s4 }
  0x1a   : > { %424 = vmatprep.mubr.msk.bf16.mxu0 %vm279_vm0, %v488_v5  ;;  %s495_s5 = scalar_lea.vmem %s494_s4, 512  ;;  %p496_p0 = scmp.lt.s32.totalorder %s674_s20, %s494_s4 }
  0x1b   : > { %290 = vmatpush1.bf16.msra.mxu0 %v477_v4  ;;  %p497_p1 = scmp.lt.s32.totalorder %s495_s5, %s489_s29 }
  0x1c   : > { %291 = vmatprep.subr.bf16.mxu0 %v553_v1 }
  0x1d   : > { %p498_p2 = por %p497_p1, %p496_p0 }
  0x1f   : > { %292 = vmatpush1.bf16.msra.mxu0 %v478_v6  ;;  %p499_p3 = pnand %p498_p2, %p492_p13 }
  0x20   : > { %293 = vmatprep.subr.bf16.mxu0 %v553_v1 }
  0x23   : > { %294 = vmatpush1.bf16.msra.mxu0 %v479_v7 }
  0x24   : > { %295 = vmatprep.subr.bf16.mxu0 %v553_v1 }
  0x27   : > { %296 = vmatpush1.bf16.msra.mxu0 %v480_v8 }
  0x28   : > { %297 = vmatprep.subr.bf16.mxu0 %v553_v1 }
  0x2b   : > { %298 = vmatpush1.bf16.msra.mxu0 %v481_v9 }
  0x2c   : > { %299 = vmatprep.subr.bf16.mxu0 %v553_v1 }
  0x2f   : > { %300 = vmatpush1.bf16.msra.mxu0 %v482_v10 }
  0x30   : > { %301 = vmatprep.subr.bf16.mxu0 %v553_v1 }
  0x33   : > { %302 = vmatpush1.bf16.msra.mxu0 %v483_v11 }
  0x34   : > { %303 = vmatprep.subr.bf16.mxu0 %v553_v1 }
  0x37   : > { %304 = vmatpush1.bf16.msra.mxu0 %v484_v12 }
  0x38   : > { %305 = vmatprep.subr.bf16.mxu0 %v553_v1 }
  0x3b   : > { %306 = vmatpush1.bf16.msra.mxu0 %v485_v13 }
  0x3e   : > { %316 = vmatmul.mubr.bf16.vlgmr.msra.gmra.mrb[0].mxu0 %v486_v14 }
 0x111   : > { %v317_v16 = vpop.f32.mrb[0].mxu0 }
 0x112   : > { %v318_v18 = vadd.f32 %v317_v16, %v196_v15  ;;  %v319_v19 = vpop.f32.mrb[1].mxu0 }
 0x113   : > { %v320_v20 = vpop.f32.mrb[2].mxu0 }
 0x114   : > { %325 = vst.msk [vmem:[%s163_s19] sm:$0xff] %vm324_vm1, %v318_v18  ;;  %v321_v21 = vadd.f32 %v320_v20, %v197_v17  ;;  %v322_v22 = vpop.f32.mrb[3].mxu0 }
 0x116   : > { %326 = vst.msk [vmem:[%s163_s19 + $0x8] sm:$0xff] %vm324_vm1, %v321_v21 }
 0x117   : > { %502 = shalt.err (!%p499_p3)
}
 0x118   : > { %s503_s6 = scalar_lea.hbm %s679_s28, 256  ;;  %s507_s10 = scalar_lea.hbm %s725_s3, 512 }
 0x119   : > { %p504_p4 = scmp.ne.s32.totalorder %s679_s28, %s503_s6  ;;  %p508_p9 = scmp.lt.u32.totalorder %s679_s28, %s725_s3 }
 0x11a   : > { %p509_p10 = scmp.lt.u32.totalorder %s507_s10, %s503_s6  ;;  %p511_p12 = scmp.lt.u32.totalorder %s503_s6, %s679_s28 }
 0x11b   : > { %p505_p7 = pnand %p504_p4, %p615_p5 }
 0x11c   : > { %p510_p11 = por %p509_p10, %p508_p9 }
 0x11d   : > { %p506_p8 = pneg %p505_p7 }
 0x11e   : > { %p512_p13 = por %p511_p12, %p510_p11 }
 0x120   : > { %p513_p0 = pnand %p512_p13, %p506_p8 }
 0x122   : > { %516 = shalt.err (!%p513_p0)
}
 0x123   : > { %s555_s19 = smov 128   ;;  %s556_s24 = smov 8  }
 0x124   : > { %432 = dma.vmem_to_hbm [thread:$0]  (%p615_p5), %s674_s20, 256, %s679_s28, %s681_s16, %s555_s19, %s555_s19, %s556_s24  }
 0x125 PF: > { %p438_p1 = scmp.ge.s32.totalorder %s551_s15, 2  ;;  %s356_s25 = sand.u32 1, %s539_s12  }
 0x126   : > { %s357_s26 = scalar_lea.sflag [#allocation3], %s356_s25 }
 0x127   : > { %p435_p2 = pnand %p438_p1, %p619_p6 }
 0x129   : > { %534 = dma.done.wait (!%p435_p2), %s357_s26, 256  }
 0x12a   : > { %536 = vsyncadd (!%p435_p2), %s357_s26, 4294967040  ;;  %p13_p3 = scmp.ge.s32.totalorder %s602_s18, 4   ;;  %s728_s12 = smov %s543_s13 }
 0x12b   : > { %s729_s13 = smov %s547_s14  ;;  %s730_s14 = smov %s613_s21 }
 0x12c   : > { %s731_s15 = smov %s602_s18  ;;  %15 = sbr.rel (!%p13_p3) target bundleno = 3 (0x3), region = 67 }
 0x133   :  { %362 = vsyncpa [#allocation3], 1 }
 0x134   :  { %364 = vsyncpa [#allocation3 + $0x1], 1 }

</bundles_post_ra>
